<compile_context>
chip_gen: v7x
topology: tpu7x:2x2x1
jax: 0.10.0
libtpu: 0.0.40
codegen_flags: <defaults>
</compile_context>

<pallas_src>
import jax
import jax.numpy as jnp
from jax import lax
from jax.experimental import pallas as pl
from jax.experimental.pallas import tpu as pltpu

_LANES = 128


def _round_up(x: int, m: int) -> int:
    return ((x + m - 1) // m) * m


def _sublane_multiple(dtype) -> int:
    # f32 -> 8, bf16/f16 -> 16, int8/fp8 -> 32 sublanes per native tile.
    return 8 * max(1, 4 // jnp.dtype(dtype).itemsize)


# ----------------------------------------------------------------------------------
# Kernels.  All main refs are lane-dense (block_rows, 128) tiles of the flattened
# (B*A*C) data; compute is in f32 regardless of the streamed dtype.
# ----------------------------------------------------------------------------------

def _l1_kernel(x_ref, t_ref, o_ref):
    """weights=None and code_weights=None: no weight stream at all."""
    x = x_ref[...].astype(jnp.float32)
    t = t_ref[...].astype(jnp.float32)
    t = jnp.where(jnp.isnan(t), x, t)                       # NaN target -> zero diff
    o_ref[...] = jnp.abs(x - t).astype(o_ref.dtype)


def _l1_elem_weight_kernel(x_ref, t_ref, w_ref, o_ref):
    """Generic fallback: per-element effective weight (|cw| * anchor weight) stream."""
    x = x_ref[...].astype(jnp.float32)
    t = t_ref[...].astype(jnp.float32)
    t = jnp.where(jnp.isnan(t), x, t)
    o_ref[...] = (jnp.abs(x - t) * w_ref[...]).astype(o_ref.dtype)


def _l1_anchor_weight_kernel(x_ref, t_ref, w_ref, sel_ref, o_ref):
    """C | 128 path: w_ref is (block_rows, anchors_per_row); sel_ref is a constant
    (anchors_per_row, 128) selector whose columns already carry |code_weights|, so
    w_ref @ sel_ref yields the full (block_rows, 128) per-element weight on the MXU
    (idle otherwise).  Each selector column has exactly one nonzero, so with HIGHEST
    precision the expansion is bit-exact in f32."""
    x = x_ref[...].astype(jnp.float32)
    t = t_ref[...].astype(jnp.float32)
    t = jnp.where(jnp.isnan(t), x, t)
    w = jnp.dot(w_ref[...].astype(jnp.float32), sel_ref[...],
                precision=lax.Precision.HIGHEST,
                preferred_element_type=jnp.float32)
    o_ref[...] = (jnp.abs(x - t) * w).astype(o_ref.dtype)


# ----------------------------------------------------------------------------------
# Wrapper.
# ----------------------------------------------------------------------------------

def weighted_l1_loss(inp, target, weights=None, code_weights=None, *,
                     block_rows=None, allow_input_fusion=True):
    """Pallas TPU forward of WeightedL1Loss.

    inp, target  : (B, A, C) float tensors (streamed at native dtype).
    weights      : (B, A) float or None.
    code_weights : (C,) float or None.
    Returns the un-reduced (B, A, C) loss in the input dtype.
    """
    B, A, C = inp.shape
    assert target.shape == (B, A, C)
    if weights is not None:
        weights = jnp.asarray(weights)
        assert weights.shape == (B, A)
    if code_weights is not None:
        code_weights = jnp.asarray(code_weights)
        assert code_weights.shape == (C,)

    out_dtype = jnp.result_type(inp.dtype, target.dtype)     # torch returns input dtype
    M = B * A
    n = M * C
    n_pad = _round_up(n, _LANES)           # only the lane axis ever needs padding
    rows = n_pad // _LANES

    no_weight = weights is None and code_weights is None
    # In-kernel per-anchor expansion needs each 128-lane row to hold an integer number
    # of anchors -> C must divide 128; keep C <= 16 so the selector K-dim stays sane.
    anchor_path = (not no_weight) and C <= 16 and (_LANES % C == 0)

    # ---- block sizing -----------------------------------------------------------
    w_dtype = jnp.dtype(jnp.float32) if weights is None else jnp.dtype(weights.dtype)
    blocked_dtypes = [jnp.dtype(inp.dtype), jnp.dtype(target.dtype), jnp.dtype(out_dtype)]
    if anchor_path:
        blocked_dtypes.append(w_dtype)
    elif not no_weight:
        blocked_dtypes.append(jnp.dtype(jnp.float32))         # w_eff stream
    sub = max(_sublane_multiple(d) for d in blocked_dtypes)
    widest = max(d.itemsize for d in blocked_dtypes)
    if block_rows is None:
        # ~2 MiB per widest buffer: past the measured ~85% HBM-roofline knee; 4 streams
        # x 2 buffers stays well under the explicit vmem_limit below on v5e/v6e/v7x.
        block_rows = max(sub, (2 * 1024 * 1024) // (_LANES * widest))

    if rows <= sub:
        br = rows                                             # single full-dim block
    else:
        br0 = max(sub, min(block_rows, rows))
        # >=2 blocks so a v7x megacore shards the "parallel" axis across both
        # TensorCores; on 1-TC chips the extra grid step is ~0.35 us, negligible.
        n_blk = max(2, pl.cdiv(rows, br0))
        br = _round_up(pl.cdiv(rows, n_blk), sub)             # rebalanced block height
    n_blocks = pl.cdiv(rows, br)                              # remainder block is masked

    # Double-buffered VMEM footprint -> explicit limit so larger user blocks still
    # compile on v5e's 16 MiB scoped default; capped below v7x's 64 MiB physical VMEM.
    stream_bytes = br * _LANES * (jnp.dtype(inp.dtype).itemsize
                                  + jnp.dtype(target.dtype).itemsize
                                  + jnp.dtype(out_dtype).itemsize)
    if anchor_path:
        stream_bytes += br * (_LANES // C) * w_dtype.itemsize + (_LANES // C) * _LANES * 4
    elif not no_weight:
        stream_bytes += br * _LANES * 4
    vmem_limit = int(min(max(32 << 20, 2 * stream_bytes + (8 << 20)), 48 << 20))

    # ---- lane-dense flat views (free reshape when n % 128 == 0) ------------------
    def _flat(a):
        a = a.reshape(-1)
        if n_pad != n:
            # Real HBM copy; only hit when B*A*C is not a multiple of 128.
            a = jnp.pad(a, (0, n_pad - n))
        return a.reshape(rows, _LANES)

    x2, t2 = _flat(inp), _flat(target)
    big_spec = pl.BlockSpec((br, _LANES), lambda i: (i, 0))

    if no_weight:
        kernel, extra, extra_specs = _l1_kernel, (), []
    elif anchor_path:
        apr = _LANES // C                                     # anchors per lane row
        w_flat = (weights.reshape(M) if weights is not None
                  else jnp.ones((M,), jnp.float32))           # cw-only: tiny 1/C stream
        if rows * apr != M:                                   # tiny pad (1/C of the data)
            w_flat = jnp.pad(w_flat, (0, rows * apr - M))
        w_rows = w_flat.reshape(rows, apr)
        lane = jnp.arange(_LANES)
        sel = (lane[None, :] // C == jnp.arange(apr)[:, None]).astype(jnp.float32)
        if code_weights is not None:
            # fold |cw| in: (w @ sel)[r, l] = w[anchor(l)] * |cw[code(l)]|  (exact)
            sel = sel * jnp.abs(code_weights.astype(jnp.float32))[lane % C][None, :]
        kernel = _l1_anchor_weight_kernel
        extra = (w_rows, sel)
        extra_specs = [pl.BlockSpec((br, apr), lambda i: (i, 0)),
                       pl.BlockSpec((apr, _LANES), lambda i: (0, 0))]
    else:
        # Generic fallback.  |d*cw|*w == |d|*(|cw|*w): build the per-element weight
        # from the tiny (B,A)/(C,) sources; allow_input_fusion asks XLA to fuse this
        # broadcast producer into the kernel's input DMA instead of writing it to HBM.
        if weights is None:
            w_eff = jnp.broadcast_to(
                jnp.abs(code_weights.astype(jnp.float32)).reshape(1, 1, C), (B, A, C))
        elif code_weights is None:
            w_eff = jnp.broadcast_to(weights.astype(jnp.float32)[:, :, None], (B, A, C))
        else:
            w_eff = (weights.astype(jnp.float32)[:, :, None]
                     * jnp.abs(code_weights.astype(jnp.float32)).reshape(1, 1, C))
        kernel = _l1_elem_weight_kernel
        extra = (_flat(w_eff),)
        extra_specs = [big_spec]

    inputs = (x2, t2) + extra
    compiler_params = pltpu.CompilerParams(
        dimension_semantics=("parallel",),
        vmem_limit_bytes=vmem_limit,
        allow_input_fusion=([True] * len(inputs)) if allow_input_fusion else None,
    )

    out2 = pl.pallas_call(
        kernel,
        out_shape=jax.ShapeDtypeStruct((rows, _LANES), out_dtype),
        grid=(n_blocks,),
        in_specs=[big_spec, big_spec] + extra_specs,
        out_specs=big_spec,
        compiler_params=compiler_params,
    )(*inputs)

    if n_pad != n:
        return out2.reshape(-1)[:n].reshape(B, A, C)
    return out2.reshape(B, A, C)


# ----------------------------------------------------------------------------------
# Pure-JAX reference mirroring the PyTorch forward.
# ----------------------------------------------------------------------------------

def _reference(inp, target, weights=None, code_weights=None):
    t = jnp.where(jnp.isnan(target), inp, target)
    diff = inp - t
    if code_weights is not None:
        diff = diff * code_weights.reshape(1, 1, -1)
    loss = jnp.abs(diff)
    if weights is not None:
        loss = loss * weights[..., None]
    return loss


if __name__ == "__main__":
    key = jax.random.PRNGKey(0)
    k1, k2, k3, k4 = jax.random.split(key, 4)

    # --- Case 1: generic path (C=7 does not divide 128): fused w_eff stream; also
    # exercises flat padding, the masked remainder row-block and the >=2-block grid.
    B, A, C = 2, 500, 7
    x = jax.random.normal(k1, (B, A, C), jnp.float32)
    t = jax.random.normal(k2, (B, A, C), jnp.float32)
    t = jnp.where(jax.random.bernoulli(k4, 0.1, (B, A, C)), jnp.nan, t)
    w = jax.random.uniform(k3, (B, A), jnp.float32)
    cw = jnp.linspace(-1.5, 2.0, C, dtype=jnp.float32)       # negative entry on purpose

    out = jax.block_until_ready(weighted_l1_loss(x, t, w, cw))
    assert out.shape == (B, A, C) and out.dtype == x.dtype
    assert bool(jnp.allclose(out, _reference(x, t, w, cw), atol=1e-6, rtol=1e-5)), \
        "mismatch: generic path"

    # --- Case 2: no-weights fast path (2-input kernel, no weight stream).
    out0 = jax.block_until_ready(weighted_l1_loss(x, t))
    assert bool(jnp.allclose(out0, _reference(x, t), atol=1e-6, rtol=1e-5)), \
        "mismatch: no-weight path"

    # --- Case 3: anchor-weight path (C=8 divides 128): per-anchor weights expanded
    # in-kernel with the selector matmul; no (B, A, C) weight tensor and no padding.
    B3, A3, C3 = 2, 512, 8
    x3 = jax.random.normal(k1, (B3, A3, C3), jnp.float32)
    t3 = jax.random.normal(k2, (B3, A3, C3), jnp.float32)
    t3 = jnp.where(jax.random.bernoulli(k4, 0.1, (B3, A3, C3)), jnp.nan, t3)
    w3 = jax.random.uniform(k3, (B3, A3), jnp.float32)
    cw3 = jnp.linspace(-1.0, 1.5, C3, dtype=jnp.float32)
    out3 = jax.block_until_ready(weighted_l1_loss(x3, t3, w3, cw3))
    assert bool(jnp.allclose(out3, _reference(x3, t3, w3, cw3), atol=1e-5, rtol=1e-4)), \
        "mismatch: anchor path"

    # --- Case 4: bf16 inputs streamed at native dtype, bf16 output (dtype preserved).
    xb = x3.astype(jnp.bfloat16)
    tb = t3.astype(jnp.bfloat16)
    outb = jax.block_until_ready(weighted_l1_loss(xb, tb, w3, cw3))
    refb = _reference(xb.astype(jnp.float32), tb.astype(jnp.float32), w3, cw3)
    assert outb.dtype == jnp.bfloat16
    assert bool(jnp.allclose(outb.astype(jnp.float32), refb.astype(jnp.bfloat16).astype(jnp.float32),
                             atol=1e-2, rtol=1e-2)), "mismatch: bf16 path"

    print("KERNEL_OK")
</pallas_src>

<mosaic_0001>
module attributes {stable_mosaic.version = 11 : i64} {
  func.func @_l1_elem_weight_kernel(%arg0: i32, %arg1: memref<32x128xf32, #tpu.memory_space<vmem>>, %arg2: memref<32x128xf32, #tpu.memory_space<vmem>>, %arg3: memref<32x128xf32, #tpu.memory_space<vmem>>, %arg4: memref<32x128xf32, #tpu.memory_space<vmem>>) attributes {dimension_semantics = [#tpu.dimension_semantics<parallel>], iteration_bounds = array<i64: 2>, scalar_prefetch = 0 : i64, scratch_operands = 0 : i64, tpu.core_type = #tpu.core_type<tc>, window_params = [{transform_indices = @transform_0, window_bounds = array<i64: 32, 128>}, {transform_indices = @transform_1, window_bounds = array<i64: 32, 128>}, {transform_indices = @transform_2, window_bounds = array<i64: 32, 128>}, {transform_indices = @transform_3, window_bounds = array<i64: 32, 128>}]} {
    %c0 = arith.constant 0 : index
    %c0_0 = arith.constant 0 : index
    %0 = vector.load %arg1[%c0, %c0_0] : memref<32x128xf32, #tpu.memory_space<vmem>>, vector<32x128xf32>
    %c0_1 = arith.constant 0 : index
    %c0_2 = arith.constant 0 : index
    %1 = vector.load %arg2[%c0_1, %c0_2] : memref<32x128xf32, #tpu.memory_space<vmem>>, vector<32x128xf32>
    %2 = arith.cmpf one, %1, %1 : vector<32x128xf32>
    %3 = arith.select %2, %0, %1 : vector<32x128xi1>, vector<32x128xf32>
    %4 = arith.subf %0, %3 : vector<32x128xf32>
    %5 = math.absf %4 : vector<32x128xf32>
    %c0_3 = arith.constant 0 : index
    %c0_4 = arith.constant 0 : index
    %6 = vector.load %arg3[%c0_3, %c0_4] : memref<32x128xf32, #tpu.memory_space<vmem>>, vector<32x128xf32>
    %7 = arith.mulf %5, %6 : vector<32x128xf32>
    %c0_5 = arith.constant 0 : index
    %c0_6 = arith.constant 0 : index
    %8 = vector.load %arg4[%c0_5, %c0_6] : memref<32x128xf32, #tpu.memory_space<vmem>>, vector<32x128xf32>
    tpu.vector_store %arg4[%c0_5, %c0_6], %7 {strides = array<i32>} : memref<32x128xf32, #tpu.memory_space<vmem>>, vector<32x128xf32>,
    return
  }
  func.func @transform_0(%arg0: i32) -> (i32, i32) {
    %c0_i32 = arith.constant 0 : i32
    %c0_i32_0 = arith.constant 0 : i32
    return %arg0, %c0_i32 : i32, i32
  }
  func.func @transform_1(%arg0: i32) -> (i32, i32) {
    %c0_i32 = arith.constant 0 : i32
    %c0_i32_0 = arith.constant 0 : i32
    return %arg0, %c0_i32 : i32, i32
  }
  func.func @transform_2(%arg0: i32) -> (i32, i32) {
    %c0_i32 = arith.constant 0 : i32
    %c0_i32_0 = arith.constant 0 : i32
    return %arg0, %c0_i32 : i32, i32
  }
  func.func @transform_3(%arg0: i32) -> (i32, i32) {
    %c0_i32 = arith.constant 0 : i32
    %c0_i32_0 = arith.constant 0 : i32
    return %arg0, %c0_i32 : i32, i32
  }
}

</mosaic_0001>

<bundles_post_ra>
// kernel: tpu_custom_call.1
= control target key start
LH: loop header
LB: loop body
LE: loop exit
PB: predicated region body
PF: predicated region fallthrough
CT: control target
= control target key end

     0   :  { %8 = vsyncpa [#allocation3], 0  ;;  %s1032_s0 = inlined_call_operand.hbm [shape: f32[55,128], index: 0, kind: input, shape index: {}]   ;;  %s1033_s1 = inlined_call_operand.hbm [shape: f32[55,128], index: 1, kind: input, shape index: {}]   ;;  %s1034_s2 = inlined_call_operand.hbm [shape: f32[55,128], index: 2, kind: input, shape index: {}]   ;;  %s1035_s3 = inlined_call_operand.hbm [shape: f32[55,128], index: 3, kind: output, shape index: {}]  }
   0x1   :  { %10 = vsyncpa [#allocation3 + $0x1], 0 }
   0x2   :  { %11 = vsyncpa [#allocation6], 0 }
   0x3   :  { %13 = vsyncpa [#allocation6 + $0x1], 0 }
   0x4   :  { %14 = vsyncpa [#allocation4], 0 }
   0x5   :  { %16 = vsyncpa [#allocation4 + $0x1], 0  ;;  %s755_s12 = smov 0   ;;  %s757_s13 = smov 0  }
   0x6   :  { %s759_s14 = smov 0   ;;  %s761_s15 = smov 0  }
   0x7 LB: > { %s776_s16 = sadd.s32 4294967295, %s721_s15   ;;  %s476_s17 = sadd.s32 4294967294, %s721_s15   ;;  %s721_s15 = sphi %s761_s15, %s1047_s15   ;;  %s717_s14 = sphi %s759_s14, %s1046_s14   ;;  %s713_s13 = sphi %s757_s13, %s1045_s13   ;;  %s709_s12 = sphi %s755_s12, %s1044_s12  }
   0x8   : > { %s780_s18 = sadd.s32 1, %s721_s15   ;;  %s29_s19 = sadd.s32 1, %s717_s14 }
   0x9   : > { %s26_s20 = ssub.s32 %s721_s15, %s780_s18  ;;  %p36_p0 = scmp.ne.s32.totalorder %s717_s14, %s713_s13 }
   0xa   : > { %p27_p1 = scmp.eq.s32.totalorder %s26_s20, 0  ;;  %p37_p2 = scmp.eq.s32.totalorder %s721_s15, 0 }
   0xb   : > { %p42_p3 = scmp.ne.s32.totalorder %s713_s13, %s709_s12  ;;  %p43_p4 = scmp.eq.s32.totalorder %s776_s16, 0 }
   0xc   : > { %s792_s21 = scalar_select %p27_p1, %s717_s14, %s29_s19  }
   0xd   : > { %p794_p5 = por %p37_p2, %p36_p0  ;;  %p798_p6 = por %p43_p4, %p42_p3 }
   0xe   : > { %p118_p7 = scmp.eq.s32.totalorder %s776_s16, 1  ;;  %p124_p8 = scmp.eq.s32.totalorder %s476_s17, 1 }
   0xf   : > { %p1036_p11 = scmp.ge.s32.totalorder %s721_s15, 2 }
  0x10   : > { %p803_p9 = por %p118_p7, %p36_p0  ;;  %p807_p10 = por %p124_p8, %p42_p3 }
  0x11   : > { %140 = sbr.rel (%p1036_p11) target bundleno = 129 (0x81), region = 16 }
  0x12   : > { %s1039_s24 = scalar_select %p803_p9, 1, 0 }
  0x13   : > { %s1040_s25 = scalar_select %p807_p10, 1, 0 }
  0x18   : > { %143 = sbr.rel (!%p794_p5) target bundleno = 59 (0x3b), region = 20  ;;  %s144_s26 = sand.u32 (%p794_p5), 1, %s717_s14  }
  0x19   : > { %s480_s27 = sshll.u32 (%p794_p5), %s721_s15, 2  ;;  %s479_s28 = sshll.u32 (%p794_p5), %s144_s26, 5 }
  0x1a   : > { %s150_s29 = ssub.s32 (%p794_p5), 7, %s480_s27  ;;  %s821_s5 = scalar_lea.sflag (%p794_p5), [#allocation3], %s144_s26 }
  0x1b   : > { %p151_p12 = scmp.lt.s32.totalorder (%p794_p5), %s150_s29, 4  ;;  %s148_s6 = scalar_lea.vmem (%p794_p5), [#allocation2], %s479_s28 }
  0x1f   : > { %s1049_s29 = smov (!%p151_p12, %s150_s29), 4 }
  0x20   : > { %s818_s30 = sshll.u32 %s1049_s29, 7 }
  0x21   : > { %s155_s4 = ssub.s32 512, %s818_s30 }
  0x22   : > { %156 = vsyncadd %s821_s5, %s155_s4  ;;  %p482_p13 = scmp.ne.s32.totalorder %s818_s30, 0  ;;  %s514_s7 = sshll.u32 %s721_s15, 9 }
  0x23   : > { %s829_s10 = scalar_lea.hbm %s1032_s0, %s514_s7  ;;  %s161_s11 = sshll.u32 %s148_s6, 4  ;;  %s831_s11 = int_to_ptr.vmem [resolvable:$true] %s161_s11 }
  0x24   : > { %s567_s17 = scalar_lea.hbm %s829_s10, %s818_s30  ;;  %s571_s26 = scalar_lea.hbm %s1032_s0, 896 }
  0x25   : > { %p568_p0 = scmp.ne.s32.totalorder %s829_s10, %s567_s17  ;;  %p572_p3 = scmp.lt.u32.totalorder %s829_s10, %s1032_s0 }
  0x26   : > { %p573_p4 = scmp.lt.u32.totalorder %s571_s26, %s567_s17  ;;  %p575_p8 = scmp.lt.u32.totalorder %s567_s17, %s829_s10 }
  0x27   : > { %p569_p1 = pnand %p568_p0, %p482_p13 }
  0x28   : > { %p574_p7 = por %p573_p4, %p572_p3 }
  0x29   : > { %p570_p2 = pneg %p569_p1 }
  0x2a   : > { %p576_p12 = por %p575_p8, %p574_p7 }
  0x2c   : > { %p577_p11 = pnand %p576_p12, %p570_p2 }
  0x2e   : > { %580 = shalt.err (!%p577_p11)
}
  0x2f   : > { %s581_s29 = scalar_lea.vmem %s831_s11, %s818_s30  ;;  %s723_s4 = smov [#allocation2]  }
  0x30   : > { %p582_p0 = scmp.ne.s32.totalorder %s831_s11, %s581_s29  ;;  %s585_s6 = sshll.u32 %s723_s4, 4  ;;  %s586_s6 = int_to_ptr.vmem [resolvable:$false] %s585_s6 }
  0x31   : > { %s587_s7 = scalar_lea.vmem %s586_s6, 1024  ;;  %p588_p9 = scmp.lt.s32.totalorder %s831_s11, %s586_s6 }
  0x32   : > { %p583_p1 = pnand %p582_p0, %p482_p13  ;;  %p589_p3 = scmp.lt.s32.totalorder %s587_s7, %s581_s29 }
  0x34   : > { %p584_p10 = pneg %p583_p1  ;;  %p590_p4 = por %p589_p3, %p588_p9 }
  0x36   : > { %p591_p7 = pnand %p590_p4, %p584_p10 }
  0x38   : > { %594 = shalt.err (!%p591_p7)
}
  0x39   : > { %s724_s8 = smov 128   ;;  %s725_s9 = smov 8  }
  0x3a   : > { %167 = dma.hbm_to_vmem [thread:$0]  (%p482_p13), %s829_s10, %s818_s30, %s831_s11, %s821_s5, %s724_s8, %s724_s8, %s725_s9  }
  0x3b PF: > { %170 = sbr.rel (!%p794_p5) target bundleno = 94 (0x5e), region = 24  ;;  %s171_s17 = sand.u32 (%p794_p5), 1, %s721_s15  }
  0x3c   : > { %s173_s19 = sand.u32 (%p794_p5), 1, %s717_s14   ;;  %s487_s26 = sshll.u32 (%p794_p5), %s721_s15, 2 }
  0x3d   : > { %s486_s20 = sshll.u32 (%p794_p5), %s173_s19, 5  ;;  %s177_s27 = ssub.s32 (%p794_p5), 7, %s487_s26 }
  0x3e   : > { %p178_p9 = scmp.lt.s32.totalorder (%p794_p5), %s177_s27, 4  ;;  %s866_s4 = scalar_lea.sflag (%p794_p5), [#allocation6], %s171_s17 }
  0x3f   : > { %s175_s30 = scalar_lea.vmem (%p794_p5), [#allocation5], %s486_s20 }
  0x42   : > { %s1051_s27 = smov (!%p178_p9, %s177_s27), 4 }
  0x43   : > { %s863_s28 = sshll.u32 %s1051_s27, 7 }
  0x44   : > { %s182_s29 = ssub.s32 512, %s863_s28 }
  0x45   : > { %183 = vsyncadd %s866_s4, %s182_s29  ;;  %p489_p10 = scmp.ne.s32.totalorder %s863_s28, 0  ;;  %s515_s5 = sshll.u32 %s721_s15, 9 }
  0x46   : > { %s874_s6 = scalar_lea.hbm %s1033_s1, %s515_s5  ;;  %s188_s7 = sshll.u32 %s175_s30, 4  ;;  %s876_s7 = int_to_ptr.vmem [resolvable:$true] %s188_s7 }
  0x47   : > { %s595_s8 = scalar_lea.hbm %s874_s6, %s863_s28  ;;  %s599_s19 = scalar_lea.hbm %s1033_s1, 896 }
  0x48   : > { %p596_p11 = scmp.ne.s32.totalorder %s874_s6, %s595_s8  ;;  %p600_p8 = scmp.lt.u32.totalorder %s874_s6, %s1033_s1 }
  0x49   : > { %p601_p12 = scmp.lt.u32.totalorder %s599_s19, %s595_s8  ;;  %p603_p1 = scmp.lt.u32.totalorder %s595_s8, %s874_s6 }
  0x4a   : > { %p597_p13 = pnand %p596_p11, %p489_p10 }
  0x4b   : > { %p602_p0 = por %p601_p12, %p600_p8 }
  0x4c   : > { %p598_p2 = pneg %p597_p13 }
  0x4d   : > { %p604_p3 = por %p603_p1, %p602_p0 }
  0x4f   : > { %p605_p4 = pnand %p604_p3, %p598_p2 }
  0x51   : > { %608 = shalt.err (!%p605_p4)
}
  0x52   : > { %s609_s27 = scalar_lea.vmem %s876_s7, %s863_s28  ;;  %s726_s29 = smov [#allocation5]  }
  0x53   : > { %p610_p7 = scmp.ne.s32.totalorder %s876_s7, %s609_s27  ;;  %s613_s30 = sshll.u32 %s726_s29, 4  ;;  %s614_s30 = int_to_ptr.vmem [resolvable:$false] %s613_s30 }
  0x54   : > { %s615_s5 = scalar_lea.vmem %s614_s30, 1024  ;;  %p616_p13 = scmp.lt.s32.totalorder %s876_s7, %s614_s30 }
  0x55   : > { %p611_p9 = pnand %p610_p7, %p489_p10  ;;  %p617_p8 = scmp.lt.s32.totalorder %s615_s5, %s609_s27 }
  0x57   : > { %p612_p11 = pneg %p611_p9  ;;  %p618_p12 = por %p617_p8, %p616_p13 }
  0x59   : > { %p619_p0 = pnand %p618_p12, %p612_p11 }
  0x5b   : > { %622 = shalt.err (!%p619_p0)
}
  0x5c   : > { %s727_s10 = smov 128   ;;  %s728_s11 = smov 8  }
  0x5d   : > { %194 = dma.hbm_to_vmem [thread:$0]  (%p489_p10), %s874_s6, %s863_s28, %s876_s7, %s866_s4, %s727_s10, %s727_s10, %s728_s11  }
  0x5e PF: > { %197 = sbr.rel (!%p794_p5) target bundleno = 129 (0x81), region = 28  ;;  %s198_s8 = sand.u32 (%p794_p5), 1, %s721_s15  }
  0x5f   : > { %s200_s9 = sand.u32 (%p794_p5), 1, %s717_s14   ;;  %s494_s19 = sshll.u32 (%p794_p5), %s721_s15, 2 }
  0x60   : > { %s493_s17 = sshll.u32 (%p794_p5), %s200_s9, 5  ;;  %s204_s20 = ssub.s32 (%p794_p5), 7, %s494_s19 }
  0x61   : > { %p205_p2 = scmp.lt.s32.totalorder (%p794_p5), %s204_s20, 4  ;;  %s911_s29 = scalar_lea.sflag (%p794_p5), [#allocation6], %s198_s8 }
  0x62   : > { %s202_s28 = scalar_lea.vmem (%p794_p5), [#allocation7], %s493_s17 }
  0x65   : > { %s1053_s20 = smov (!%p205_p2, %s204_s20), 4 }
  0x66   : > { %s908_s26 = sshll.u32 %s1053_s20, 7 }
  0x67   : > { %s209_s27 = ssub.s32 512, %s908_s26 }
  0x68   : > { %210 = vsyncadd %s911_s29, %s209_s27  ;;  %p496_p5 = scmp.ne.s32.totalorder %s908_s26, 0  ;;  %s516_s22 = sshll.u32 %s721_s15, 9 }
  0x69   : > { %s919_s7 = scalar_lea.hbm %s1034_s2, %s516_s22  ;;  %s215_s30 = sshll.u32 %s202_s28, 4  ;;  %s921_s30 = int_to_ptr.vmem [resolvable:$true] %s215_s30 }
  0x6a   : > { %s623_s5 = scalar_lea.hbm %s919_s7, %s908_s26  ;;  %s627_s8 = scalar_lea.hbm %s1034_s2, 896 }
  0x6b   : > { %p624_p10 = scmp.ne.s32.totalorder %s919_s7, %s623_s5  ;;  %p628_p4 = scmp.lt.u32.totalorder %s919_s7, %s1034_s2 }
  0x6c   : > { %p629_p7 = scmp.lt.u32.totalorder %s627_s8, %s623_s5  ;;  %p631_p11 = scmp.lt.u32.totalorder %s623_s5, %s919_s7 }
  0x6d   : > { %p625_p1 = pnand %p624_p10, %p496_p5 }
  0x6e   : > { %p630_p9 = por %p629_p7, %p628_p4 }
  0x6f   : > { %p626_p3 = pneg %p625_p1 }
  0x70   : > { %p632_p13 = por %p631_p11, %p630_p9 }
  0x72   : > { %p633_p8 = pnand %p632_p13, %p626_p3 }
  0x74   : > { %636 = shalt.err (!%p633_p8)
}
  0x75   : > { %s637_s19 = scalar_lea.vmem %s921_s30, %s908_s26  ;;  %s729_s20 = smov [#allocation7]  }
  0x76   : > { %p638_p12 = scmp.ne.s32.totalorder %s921_s30, %s637_s19  ;;  %s641_s27 = sshll.u32 %s729_s20, 4  ;;  %s642_s27 = int_to_ptr.vmem [resolvable:$false] %s641_s27 }
  0x77   : > { %s643_s28 = scalar_lea.vmem %s642_s27, 1024  ;;  %p644_p10 = scmp.lt.s32.totalorder %s921_s30, %s642_s27 }
  0x78   : > { %p639_p0 = pnand %p638_p12, %p496_p5  ;;  %p645_p1 = scmp.lt.s32.totalorder %s643_s28, %s637_s19 }
  0x7a   : > { %p640_p2 = pneg %p639_p0  ;;  %p646_p4 = por %p645_p1, %p644_p10 }
  0x7c   : > { %p647_p7 = pnand %p646_p4, %p640_p2 }
  0x7e   : > { %650 = shalt.err (!%p647_p7)
}
  0x7f   : > { %s730_s22 = smov 128   ;;  %s731_s4 = smov 8  }
  0x80   : > { %221 = dma.hbm_to_vmem [thread:$0]  (%p496_p5), %s919_s7, %s908_s26, %s921_s30, %s911_s29, %s730_s22, %s730_s22, %s731_s4  }
  0x81 PF: > { %p500_p3 = scmp.ge.s32.totalorder %s721_s15, 1  ;;  %p223_p9 = scmp.lt.s32.totalorder %s721_s15, 3 }
  0x83   : > { %p224_p11 = pnand %p500_p3, %p223_p9 }
  0x84   : > { %s951_s6 = sand.u32 (!%p224_p11), 1, %s713_s13  }
  0x85   : > { %227 = sbr.rel (%p224_p11) target bundleno = 185 (0xb9), region = 32  ;;  %s954_s5 = sshll.u32 (!%p224_p11), %s951_s6, 5 }
  0x86   : > { %s230_s10 = scalar_lea.sflag (!%p224_p11), [#allocation3], %s951_s6  ;;  %s233_s11 = scalar_lea.vmem (!%p224_p11), [#allocation2], %s954_s5 }
  0x8c   : > { %696 = dma.done.wait (%p798_p6), %s230_s10, 512  }
  0x8d   : > { %698 = vsyncadd (%p798_p6), %s230_s10, 4294966784  ;;  %s238_s26 = sand.u32 1, %s776_s16   ;;  %s242_s7 = scalar_lea.vmem [#allocation5], %s954_s5 }
  0x8e   : > { %s239_s29 = scalar_lea.sflag [#allocation6], %s238_s26 }
  0x8f   : > { %700 = dma.done.wait (%p798_p6), %s239_s29, 1024  }
  0x90   : > { %702 = vsyncadd (%p798_p6), %s239_s29, 4294966272  ;;  %v304_v0 = vld [vmem:[%s233_s11] sm:$0xff]  ;;  %v305_v2 = vld [vmem:[%s233_s11 + $0x8] sm:$0xff]  ;;  %s251_s30 = scalar_lea.vmem [#allocation7], %s954_s5  ;;  %s283_s23 = scalar_lea.vmem [#allocation8], %s954_s5 }
  0x91   : > { %v308_v1 = vld [vmem:[%s242_s7] sm:$0xff]  ;;  %v309_v3 = vld [vmem:[%s242_s7 + $0x8] sm:$0xff]  ;;  %v306_v5 = vld [vmem:[%s233_s11 + $0x10] sm:$0xff]  ;;  %s341_s8 = scalar_lea.sflag [#allocation4], %s951_s6  ;;  %p1041_p6 = scmp.ne.s32.totalorder %s1039_s24, 0 }
  0x92   : > { %vm312_vm0 = vcmp.ne.f32.partialorder %v308_v1, %v308_v1  ;;  %vm313_vm1 = vcmp.ne.f32.partialorder %v309_v3, %v309_v3  ;;  %v310_v6 = vld [vmem:[%s242_s7 + $0x10] sm:$0xff]  ;;  %v307_v9 = vld [vmem:[%s233_s11 + $0x18] sm:$0xff]  ;;  %v328_v11 = vld [vmem:[%s251_s30] sm:$0xff]  ;;  %s506_s9 = sshll.u32 (%p1041_p6), %s776_s16, 2 }
  0x93   : > { %v316_v4 = vsel %vm312_vm0, %v304_v0, %v308_v1  ;;  %v317_v8 = vsel %vm313_vm1, %v305_v2, %v309_v3  ;;  %vm314_vm2 = vcmp.ne.f32.partialorder %v310_v6, %v310_v6  ;;  %v311_v10 = vld [vmem:[%s242_s7 + $0x18] sm:$0xff]  ;;  %v329_v15 = vld [vmem:[%s251_s30 + $0x8] sm:$0xff]  ;;  %v330_v19 = vld [vmem:[%s251_s30 + $0x10] sm:$0xff]  ;;  %s349_s17 = ssub.s32 (%p1041_p6), 7, %s506_s9 }
  0x94   : > { %v320_v7 = vsub.f32 %v304_v0, %v316_v4  ;;  %v321_v12 = vsub.f32 %v305_v2, %v317_v8  ;;  %v318_v13 = vsel %vm314_vm2, %v306_v5, %v310_v6  ;;  %vm315_vm3 = vcmp.ne.f32.partialorder %v311_v10, %v311_v10  ;;  %v331_v23 = vld [vmem:[%s251_s30 + $0x18] sm:$0xff]  ;;  %p350_p5 = scmp.lt.s32.totalorder (%p1041_p6), %s349_s17, 4 }
  0x95   : > { %v322_v16 = vsub.f32 %v306_v5, %v318_v13  ;;  %v319_v17 = vsel %vm315_vm3, %v307_v9, %v311_v10 }
  0x96   : > { %v324_v14 = vand.u32 2147483647, %v320_v7  ;;  %v325_v18 = vand.u32 2147483647, %v321_v12  ;;  %v323_v20 = vsub.f32 %v307_v9, %v319_v17  ;;  %347 = sbr.rel (!%p1041_p6) target bundleno = 185 (0xb9), region = 48 }
  0x97   : > { %v326_v22 = vand.u32 2147483647, %v322_v16 }
  0x98   : > { %v332_v21 = vmul.f32 %v328_v11, %v324_v14  ;;  %v333_v24 = vmul.f32 %v329_v15, %v325_v18  ;;  %v327_v25 = vand.u32 2147483647, %v323_v20 }
  0x99   : > { %v334_v26 = vmul.f32 %v330_v19, %v326_v22 }
  0x9a   : > { %336 = vst [vmem:[%s283_s23] sm:$0xff] %v332_v21  ;;  %337 = vst [vmem:[%s283_s23 + $0x8] sm:$0xff] %v333_v24  ;;  %v335_v27 = vmul.f32 %v331_v23, %v327_v25 }
  0x9b   : > { %338 = vst [vmem:[%s283_s23 + $0x10] sm:$0xff] %v334_v26 }
  0x9c   : > { %339 = vst [vmem:[%s283_s23 + $0x18] sm:$0xff] %v335_v27 }
  0x9d   : > { %s1055_s17 = smov (!%p350_p5, %s349_s17), 4 }
  0x9e   : > { %s974_s19 = sshll.u32 %s1055_s17, 7 }
  0x9f   : > { %s354_s20 = ssub.s32 512, %s974_s19 }
  0xa0   : > { %355 = vsyncadd %s341_s8, %s354_s20  ;;  %p508_p13 = scmp.ne.s32.totalorder %s974_s19, 0  ;;  %s517_s27 = sshll.u32 %s776_s16, 9 }
  0xa1   : > { %s984_s22 = scalar_lea.hbm %s1035_s3, %s517_s27  ;;  %s360_s4 = sshll.u32 %s283_s23, 4  ;;  %s986_s4 = int_to_ptr.vmem [resolvable:$true] %s360_s4 }
  0xa2   : > { %s651_s5 = scalar_lea.vmem %s986_s4, %s974_s19  ;;  %s732_s10 = smov [#allocation8]  }
  0xa3   : > { %p652_p8 = scmp.ne.s32.totalorder %s986_s4, %s651_s5  ;;  %s655_s11 = sshll.u32 %s732_s10, 4  ;;  %s656_s11 = int_to_ptr.vmem [resolvable:$false] %s655_s11 }
  0xa4   : > { %s657_s16 = scalar_lea.vmem %s656_s11, 1024  ;;  %p658_p2 = scmp.lt.s32.totalorder %s986_s4, %s656_s11 }
  0xa5   : > { %p653_p12 = pnand %p652_p8, %p508_p13  ;;  %p659_p10 = scmp.lt.s32.totalorder %s657_s16, %s651_s5 }
  0xa7   : > { %p654_p0 = pneg %p653_p12  ;;  %p660_p1 = por %p659_p10, %p658_p2 }
  0xa9   : > { %p661_p4 = pnand %p660_p1, %p654_p0 }
  0xab   : > { %664 = shalt.err (!%p661_p4)
}
  0xac   : > { %s665_s26 = scalar_lea.hbm %s984_s22, %s974_s19  ;;  %s669_s30 = scalar_lea.hbm %s1035_s3, 896 }
  0xad   : > { %p666_p7 = scmp.ne.s32.totalorder %s984_s22, %s665_s26  ;;  %p670_p11 = scmp.lt.u32.totalorder %s984_s22, %s1035_s3 }
  0xae   : > { %p671_p6 = scmp.lt.u32.totalorder %s669_s30, %s665_s26  ;;  %p673_p8 = scmp.lt.u32.totalorder %s665_s26, %s984_s22 }
  0xaf   : > { %p667_p3 = pnand %p666_p7, %p508_p13 }
  0xb0   : > { %p672_p5 = por %p671_p6, %p670_p11 }
  0xb1   : > { %p668_p9 = pneg %p667_p3 }
  0xb2   : > { %p674_p12 = por %p673_p8, %p672_p5 }
  0xb4   : > { %p675_p0 = pnand %p674_p12, %p668_p9 }
  0xb6   : > { %678 = shalt.err (!%p675_p0)
}
  0xb7   : > { %s733_s17 = smov 128   ;;  %s734_s20 = smov 8  }
  0xb8   : > { %366 = dma.vmem_to_hbm [thread:$0]  (%p508_p13), %s986_s4, %s974_s19, %s984_s22, %s341_s8, %s733_s17, %s733_s17, %s734_s20  }
  0xb9 PF: > { %s375_s27 = sand.u32 1, %s709_s12   ;;  %p1042_p2 = scmp.ne.s32.totalorder %s1040_s25, 0 }
  0xba   : > { %p1043_p10 = scmp.ge.s32.totalorder %s721_s15, 2  ;;  %s376_s24 = scalar_lea.sflag [#allocation4], %s375_s27 }
  0xbc   : > { %p523_p1 = pnand %p1043_p10, %p1042_p2 }
  0xbe   : > { %704 = dma.done.wait (!%p523_p1), %s376_s24, 512  }
  0xbf   : > { %706 = vsyncadd (!%p523_p1), %s376_s24, 4294966784  ;;  %p19_p4 = scmp.ge.s32.totalorder %s780_s18, 4   ;;  %s1044_s12 = smov %s713_s13 }
  0xc0   : > { %s1045_s13 = smov %s717_s14  ;;  %s1046_s14 = smov %s792_s21 }
  0xc1   : > { %s1047_s15 = smov %s780_s18  ;;  %21 = sbr.rel (!%p19_p4) target bundleno = 7 (0x7), region = 101 }
  0xc8   :  { %381 = vsyncpa [#allocation3], 1 }
  0xc9   :  { %383 = vsyncpa [#allocation3 + $0x1], 1 }
  0xca   :  { %384 = vsyncpa [#allocation6], 1 }
  0xcb   :  { %386 = vsyncpa [#allocation6 + $0x1], 1 }
  0xcc   :  { %387 = vsyncpa [#allocation4], 1 }
  0xcd   :  { %389 = vsyncpa [#allocation4 + $0x1], 1 }

</bundles_post_ra>
